<compile_context>
chip_gen: v7x
topology: tpu7x:2x2x1
jax: 0.10.0
libtpu: 0.0.40
codegen_flags: <defaults>
</compile_context>

<pallas_src>
import functools
import math

import jax
import jax.numpy as jnp
from jax.experimental import pallas as pl
from jax.experimental.pallas import tpu as pltpu

_LANE = 128


def _sublane_for(dtype):
    # Packed-sublane count: 8 rows for 4-byte dtypes, 16 for bf16, 32 for int8/fp8.
    return max(8, 32 // jnp.dtype(dtype).itemsize)


def _forward_impl_kernel(x_ref, o_ref, *, tile_fn):
    """Per-tile body of GPUOptimizedModel._forward_impl.

    The base class leaves _forward_impl abstract; `tile_fn` is the hook where a
    subclass's per-tile (elementwise, dtype-preserving) compute goes.
    """
    # TODO(synk): _forward_impl raises NotImplementedError in the PyTorch base
    # class; real subclass compute (conv / matmul) should use an accumulator
    # grid (reduction axis last, pl.when init/finalize), not this elementwise
    # copy structure.
    o_ref[...] = tile_fn(x_ref[...])


def _choose_layout(total, dtype):
    """Pick (tn, rows, tm, n_blocks, pad) for a lane-dense (rows, TN) slab."""
    itemsize = jnp.dtype(dtype).itemsize
    sub = _sublane_for(dtype)

    # TN: widest multiple of 128 dividing total -> zero padding, free reshapes.
    tn = None
    for cand in (2048, 1024, 512, 256, _LANE):
        if total % cand == 0:
            tn = cand
            break
    pad = 0
    if tn is None:
        # Ragged fallback (element count not a multiple of 128): minimal pad.
        tn = _LANE
        pad = (-total) % tn
    rows = (total + pad) // tn

    # ~4 MiB per block; in+out double-buffered = ~16 MiB of VMEM.
    block_bytes = 4 * 1024 * 1024
    budget_rows = max(sub, block_bytes // (tn * itemsize))
    tm = max(sub, (budget_rows // sub) * sub)
    tm = min(tm, 2048)

    if tm >= rows:
        if rows >= 2 * sub:
            # Keep >= 2 blocks so the "parallel" axis splits over v7x's 2 TCs.
            half = -(-rows // 2)
            tm = -(-half // sub) * sub
        else:
            # Single full-extent block (block dim == array dim satisfies the
            # (8,128) layout rule even for tiny row counts).
            tm = rows

    n_blocks = pl.cdiv(rows, tm)
    return tn, rows, tm, n_blocks, pad


@functools.lru_cache(maxsize=None)
def _build_forward(shape, dtype_name, tile_fn, alias_input, remat):
    """Build (and cache) the jitted forward for one (shape, dtype, config)."""
    dtype = jnp.dtype(dtype_name)
    total = math.prod(shape)
    tn, rows, tm, n_blocks, pad = _choose_layout(total, dtype)

    # Remat needs the input as a residual -> donation/aliasing is disabled.
    alias = bool(alias_input) and not remat

    kernel = functools.partial(_forward_impl_kernel, tile_fn=tile_fn)

    def run(xin):
        flat = xin.reshape(-1)
        if pad:
            flat = jnp.pad(flat, (0, pad))
        x2d = flat.reshape(rows, tn)  # free bitcast when pad == 0
        out2d = pl.pallas_call(
            kernel,
            out_shape=jax.ShapeDtypeStruct((rows, tn), dtype),
            grid=(n_blocks,),
            in_specs=[pl.BlockSpec((tm, tn), lambda i: (i, 0))],
            out_specs=pl.BlockSpec((tm, tn), lambda i: (i, 0)),
            input_output_aliases={0: 0} if alias else {},
            compiler_params=pltpu.CompilerParams(
                dimension_semantics=("parallel",),   # v7x: shard blocks over 2 TCs
                vmem_limit_bytes=32 * 1024 * 1024,   # explicit, safe on all gens
            ),
            cost_estimate=pl.CostEstimate(
                flops=0,
                transcendentals=0,
                bytes_accessed=2 * total * dtype.itemsize,
            ),
        )(x2d)
        if pad:
            return out2d.reshape(-1)[:total].reshape(shape)
        return out2d.reshape(shape)

    if remat:
        # Mirrors torch.utils.checkpoint.checkpoint(self._forward_impl, x).
        run = jax.checkpoint(run)

    donate = (0,) if alias else ()
    return jax.jit(run, donate_argnums=donate)


def gpu_optimized_model_forward(x, *, training=False, enable_checkpointing=True,
                                tile_fn=None, alias_input=False):
    """Forward pass matching GPUOptimizedModel.forward.

    tile_fn: per-VMEM-tile elementwise, dtype-preserving compute of a subclass
    _forward_impl.  None means the abstract base class: forward values are a
    pure pass-through, so no kernel is launched (zero HBM traffic).
    alias_input: output reuses the donated input HBM buffer (in-place update);
    only honoured when there is real compute and no gradient checkpointing.
    Caller must not reuse x afterwards when alias_input=True.
    """
    if tile_fn is None:
        # Base class defines no transformation -> cheapest correct kernel is no
        # kernel at all.  (An explicit identity tile_fn still runs the copy.)
        return x

    remat = bool(enable_checkpointing and training)
    fwd = _build_forward(tuple(x.shape), jnp.dtype(x.dtype).name,
                         tile_fn, bool(alias_input), remat)
    return fwd(x)


if __name__ == "__main__":
    key = jax.random.PRNGKey(0)
    x = jax.random.normal(key, (2, 4, 16, 16), dtype=jnp.float32)

    # 1) Base-class semantics: _forward_impl is abstract -> pure pass-through,
    #    no kernel launched.
    y_fast = gpu_optimized_model_forward(x, training=False)
    assert y_fast.shape == x.shape and y_fast.dtype == x.dtype

    # 2) Tiled Pallas path with an explicit identity tile_fn (trivial subclass).
    identity = lambda t: t
    y = gpu_optimized_model_forward(x, training=False, tile_fn=identity)
    y = jax.block_until_ready(y)
    assert y.shape == x.shape and y.dtype == x.dtype
    assert bool(jnp.allclose(y, x))

    # Second call hits the cached jitted callable (no retrace / recompile).
    y2 = gpu_optimized_model_forward(x, training=False, tile_fn=identity)
    y2 = jax.block_until_ready(y2)
    assert bool(jnp.allclose(y2, x))

    # 3) Aliased in-place variant with real per-tile compute (x2 scale).
    scale2 = lambda t: t * jnp.asarray(2.0, t.dtype)
    x_donate = x * 1.0  # fresh buffer we are allowed to donate
    y_alias = gpu_optimized_model_forward(
        x_donate, training=False, tile_fn=scale2, alias_input=True)
    y_alias = jax.block_until_ready(y_alias)
    assert bool(jnp.allclose(y_alias, 2.0 * x))

    # 4) Training + checkpointing path (remat wraps the kernel; values unchanged).
    y_train = gpu_optimized_model_forward(
        x, training=True, enable_checkpointing=True, tile_fn=scale2)
    y_train = jax.block_until_ready(y_train)
    assert bool(jnp.allclose(y_train, 2.0 * x))

    print("KERNEL_OK")
</pallas_src>

<mosaic_0001>
module attributes {stable_mosaic.version = 11 : i64} {
  func.func @_forward_impl_kernel(%arg0: i32, %arg1: memref<1x2048xf32, #tpu.memory_space<vmem>>, %arg2: memref<1x2048xf32, #tpu.memory_space<vmem>>) attributes {dimension_semantics = [#tpu.dimension_semantics<parallel>], iteration_bounds = array<i64: 1>, scalar_prefetch = 0 : i64, scratch_operands = 0 : i64, tpu.core_type = #tpu.core_type<tc>, window_params = [{transform_indices = @transform_0, window_bounds = array<i64: 1, 2048>}, {transform_indices = @transform_1, window_bounds = array<i64: 1, 2048>}]} {
    %c0 = arith.constant 0 : index
    %c0_0 = arith.constant 0 : index
    %0 = vector.load %arg1[%c0, %c0_0] : memref<1x2048xf32, #tpu.memory_space<vmem>>, vector<1x2048xf32>
    %c0_1 = arith.constant 0 : index
    %c0_2 = arith.constant 0 : index
    %1 = vector.load %arg2[%c0_1, %c0_2] : memref<1x2048xf32, #tpu.memory_space<vmem>>, vector<1x2048xf32>
    tpu.vector_store %arg2[%c0_1, %c0_2], %0 {strides = array<i32>} : memref<1x2048xf32, #tpu.memory_space<vmem>>, vector<1x2048xf32>,
    return
  }
  func.func @transform_0(%arg0: i32) -> (i32, i32) {
    %c0_i32 = arith.constant 0 : i32
    %c0_i32_0 = arith.constant 0 : i32
    return %arg0, %c0_i32 : i32, i32
  }
  func.func @transform_1(%arg0: i32) -> (i32, i32) {
    %c0_i32 = arith.constant 0 : i32
    %c0_i32_0 = arith.constant 0 : i32
    return %arg0, %c0_i32 : i32, i32
  }
}

</mosaic_0001>

<bundles_post_ra>
// kernel: run.1
= control target key start
LH: loop header
LB: loop body
LE: loop exit
PB: predicated region body
PF: predicated region fallthrough
CT: control target
= control target key end

     0   :  { %s38_s0 = inlined_call_operand.vmem [shape: f32[1,2048], index: 0, kind: input, shape index: {}]   ;;  %s39_s1 = inlined_call_operand.vmem [shape: f32[1,2048], index: 1, kind: output, shape index: {}]  }
   0x1   :  { %v8_v0 = vld [vmem:[%s38_s0] sm:$0xff]  ;;  %v9_v1 = vld [vmem:[%s38_s0 + $0x8] sm:$0xff] }
   0x2   :  { %10 = vst [vmem:[%s39_s1] sm:$0xff] %v8_v0  ;;  %11 = vst [vmem:[%s39_s1 + $0x8] sm:$0xff] %v9_v1 }

</bundles_post_ra>
